<compile_context>
chip_gen: v7x
topology: tpu7x:2x2x1
jax: 0.10.0
libtpu: 0.0.40
codegen_flags: <defaults>
</compile_context>

<pallas_src>
import functools

import jax
import jax.numpy as jnp
from jax.experimental import pallas as pl
from jax.experimental.pallas import tpu as pltpu

_NEG_BIG = -1e30      # padded-class bias -> exp(logit - max) == 0, no prob. leak
_LANE = 128
_SUBLANE = 8


def _round_up(x, m):
    return ((x + m - 1) // m) * m


def _linear_softmax_kernel(x_ref, wt_ref, b_ref, o_ref):
    # x: [TB, F] bf16, wt: [F, Np] bf16 (pre-transposed), b: [1, Np] f32,
    # o: [TB, Np] (out dtype).  Canonical MXU contraction, f32 accumulation.
    logits = jnp.dot(x_ref[...], wt_ref[...],
                     preferred_element_type=jnp.float32) + b_ref[...]

    # Numerically stable softmax over the class dim (== nn.Softmax(dim=-1)).
    m = jnp.max(logits, axis=-1, keepdims=True)
    e = jnp.exp(logits - m)
    denom = jnp.sum(e, axis=-1, keepdims=True)
    inv = pl.reciprocal(denom, approx=True)      # EUP slot
    inv = inv * (2.0 - denom * inv)              # one Newton step: exact norm., VPU-cheap
    o_ref[...] = (e * inv).astype(o_ref.dtype)


def prepare_params(weight, bias, operand_dtype=jnp.bfloat16):
    """One-time parameter prep (kept OUT of the per-call path).

    Pads the class dim to a lane multiple (padded classes get a huge negative
    bias so they receive ~0 probability), transposes the weight to [F, Np] for
    the canonical MXU contraction, and casts the weight to a bf16 MXU operand.
    Bias stays f32.
    """
    n_classes, f = weight.shape
    np_ = _round_up(n_classes, _LANE)
    w = weight.astype(jnp.float32)
    b = bias.astype(jnp.float32)
    if np_ != n_classes:
        w = jnp.pad(w, ((0, np_ - n_classes), (0, 0)))
        b = jnp.pad(b, (0, np_ - n_classes), constant_values=_NEG_BIG)
    w_t = jnp.asarray(w.T, dtype=operand_dtype)          # [F, Np]
    b2d = b.reshape(1, np_)                              # [1, Np] f32
    return w_t, b2d


def _select_tb(batch, f, np_, x_itemsize, o_itemsize, tb_cap, vmem_budget):
    """Pick the batch tile: big enough to amortize ~0.35us/step, small enough
    to fit the v7x-safe VMEM budget, and (for large B) giving >= 2 grid steps
    so the 'parallel' axis can shard across v7x's two TensorCores."""
    tb = min(tb_cap, _round_up(batch, _SUBLANE))
    if batch >= 2 * _SUBLANE:
        tb = min(tb, _round_up((batch + 1) // 2, _SUBLANE))
    w_bytes = f * np_ * x_itemsize                    # resident, single-buffered weight
    while tb > _SUBLANE:
        need = (2 * tb * f * x_itemsize               # double-buffered x tiles
                + w_bytes
                + 2 * tb * np_ * o_itemsize           # double-buffered out tiles
                + 4 * tb * np_ * 4)                   # f32 logits / exp temps headroom
        if need <= vmem_budget:
            break
        tb = max(_SUBLANE, _round_up(tb // 2, _SUBLANE))
    return tb


@functools.partial(jax.jit, static_argnames=("n_classes", "tb_cap"))
def inception_top_forward(x_nchw, w_t, b2d, *, n_classes, tb_cap=512):
    """InceptionTop('penultimate') forward: softmax(flatten(x) @ W.T + b)."""
    batch = x_nchw.shape[0]
    x2d = x_nchw.reshape(batch, -1)                   # nn.Flatten(1) -- glue
    f, np_ = w_t.shape
    assert x2d.shape[1] == f, (x2d.shape, w_t.shape)

    operand_dtype = w_t.dtype                         # bf16 MXU operands
    x2d = x2d.astype(operand_dtype)
    out_dtype = (x_nchw.dtype if jnp.issubdtype(x_nchw.dtype, jnp.floating)
                 else jnp.float32)

    xbytes = jnp.dtype(operand_dtype).itemsize
    obytes = jnp.dtype(out_dtype).itemsize
    # Budget for the smallest VMEM of the three generations (v7x: 64 MiB
    # physical per TC); leave headroom for internal scratch.
    vmem_budget = 40 * 1024 * 1024
    tb = _select_tb(batch, f, np_, xbytes, obytes, tb_cap, vmem_budget)

    bp = _round_up(batch, tb)
    if bp != batch:
        # Activation-only pad; padded rows see bias-only logits (finite, no NaN)
        # and are sliced off below.
        x2d = jnp.pad(x2d, ((0, bp - batch), (0, 0)))
    grid = (bp // tb,)

    cost = pl.CostEstimate(
        flops=2 * bp * f * np_,
        transcendentals=bp * np_,
        bytes_accessed=bp * f * xbytes + f * np_ * xbytes + bp * np_ * obytes,
    )

    out = pl.pallas_call(
        _linear_softmax_kernel,
        out_shape=jax.ShapeDtypeStruct((bp, np_), out_dtype),
        grid=grid,
        in_specs=[
            pl.BlockSpec((tb, f), lambda i: (i, 0)),              # x: batch-tiled
            pl.BlockSpec((f, np_), lambda i: (0, 0),
                         pipeline_mode=pl.Buffered(1)),           # weight: resident, single-buffered
            pl.BlockSpec((1, np_), lambda i: (0, 0),
                         pipeline_mode=pl.Buffered(1)),           # bias: resident
        ],
        out_specs=pl.BlockSpec((tb, np_), lambda i: (i, 0)),      # lane-dense (Np % 128 == 0)
        compiler_params=pltpu.CompilerParams(
            dimension_semantics=("parallel",),                    # batch rows independent
            vmem_limit_bytes=48 * 1024 * 1024,                    # safe on v5e/v6e/v7x
        ),
        cost_estimate=cost,
    )(x2d, w_t, b2d)

    return out[:batch, :n_classes]


if __name__ == "__main__":
    # Small shapes consistent with the forward: NCHW input feeding
    # Flatten(1) -> Linear(C*H*W, num_classes) -> Softmax(-1).
    # TODO(synk): the truncated Inception backbone itself ('block_*' variants)
    # is not re-implemented here; only the 'penultimate' head (Flatten+Linear+
    # Softmax) has a Pallas kernel.
    B, C, H, W = 2, 4, 16, 16          # flattened features F = 1024
    NUM_CLASSES = 8

    key = jax.random.PRNGKey(0)
    kx, kw, kb = jax.random.split(key, 3)

    x = jax.random.normal(kx, (B, C, H, W), dtype=jnp.float32)
    F = C * H * W
    # Deterministic synthetic Linear params (PyTorch layout: [out, in], [out]).
    weight = jax.random.normal(kw, (NUM_CLASSES, F), dtype=jnp.float32) * 0.05
    bias = jax.random.normal(kb, (NUM_CLASSES,), dtype=jnp.float32) * 0.05

    # One-time parameter prep (pad / transpose / bf16 cast) -- NOT per call.
    w_t, b2d = prepare_params(weight, bias)

    y = inception_top_forward(x, w_t, b2d, n_classes=NUM_CLASSES)
    y = jax.block_until_ready(y)

    # Reference with the same bf16 operand rounding (f32 accumulation) ...
    xb = x.reshape(B, -1).astype(jnp.bfloat16)
    wb = weight.astype(jnp.bfloat16)
    ref_bf16 = jax.nn.softmax(
        jnp.dot(xb, wb.T, preferred_element_type=jnp.float32) + bias, axis=-1)
    # ... and the full-f32 reference (bf16 operand rounding is the only delta).
    ref_f32 = jax.nn.softmax(x.reshape(B, -1) @ weight.T + bias, axis=-1)

    assert y.shape == (B, NUM_CLASSES)
    assert jnp.allclose(y, ref_bf16, atol=2e-3, rtol=2e-3), float(
        jnp.max(jnp.abs(y - ref_bf16)))
    assert jnp.allclose(y, ref_f32, atol=3e-2, rtol=3e-2)
    assert jnp.allclose(jnp.sum(y, axis=-1), 1.0, atol=1e-3)

    print("KERNEL_OK")
</pallas_src>

<mosaic_0001>
module attributes {stable_mosaic.version = 11 : i64} {
  func.func @_linear_softmax_kernel(%arg0: i32, %arg1: memref<8x1024xbf16, #tpu.memory_space<vmem>>, %arg2: memref<1024x128xbf16, #tpu.memory_space<vmem>>, %arg3: memref<1x128xf32, #tpu.memory_space<vmem>>, %arg4: memref<8x128xf32, #tpu.memory_space<vmem>>) attributes {dimension_semantics = [#tpu.dimension_semantics<parallel>], iteration_bounds = array<i64: 1>, scalar_prefetch = 0 : i64, scratch_operands = 0 : i64, tpu.core_type = #tpu.core_type<tc>, window_params = [{transform_indices = @transform_0, window_bounds = array<i64: 8, 1024>}, {pipeline_mode = #tpu.pipeline_mode<synchronous>, transform_indices = @transform_1, window_bounds = array<i64: 1024, 128>}, {pipeline_mode = #tpu.pipeline_mode<synchronous>, transform_indices = @transform_2, window_bounds = array<i64: 1, 128>}, {transform_indices = @transform_3, window_bounds = array<i64: 8, 128>}]} {
    %c0 = arith.constant 0 : index
    %c0_0 = arith.constant 0 : index
    %0 = vector.load %arg1[%c0, %c0_0] : memref<8x1024xbf16, #tpu.memory_space<vmem>>, vector<8x1024xbf16>
    %c0_1 = arith.constant 0 : index
    %c0_2 = arith.constant 0 : index
    %1 = vector.load %arg2[%c0_1, %c0_2] : memref<1024x128xbf16, #tpu.memory_space<vmem>>, vector<1024x128xbf16>
    %cst = arith.constant dense<0.000000e+00> : vector<8x128xf32>
    %2 = tpu.matmul %0, %1, %cst {dimension_numbers = #tpu.dot_dimension_numbers<[1], [0], [0], [1], [0, 0, 1, 1], [], []>} : vector<8x1024xbf16>, vector<1024x128xbf16>, vector<8x128xf32> -> vector<8x128xf32>
    %c0_3 = arith.constant 0 : index
    %c0_4 = arith.constant 0 : index
    %3 = vector.load %arg3[%c0_3, %c0_4] : memref<1x128xf32, #tpu.memory_space<vmem>>, vector<1x128xf32>
    %4 = vector.broadcast %3 : vector<1x128xf32> to vector<8x128xf32>
    %5 = arith.addf %2, %4 : vector<8x128xf32>
    %cst_5 = arith.constant dense<0xFF800000> : vector<8xf32>
    %6 = vector.multi_reduction <maximumf>, %5, %cst_5 [1] : vector<8x128xf32> to vector<8xf32>
    %7 = vector.shape_cast %6 : vector<8xf32> to vector<8x1xf32>
    %8 = vector.broadcast %7 : vector<8x1xf32> to vector<8x128xf32>
    %9 = arith.subf %5, %8 : vector<8x128xf32>
    %10 = math.exp %9 : vector<8x128xf32>
    %cst_6 = arith.constant dense<0.000000e+00> : vector<8xf32>
    %11 = vector.multi_reduction <add>, %10, %cst_6 [1] : vector<8x128xf32> to vector<8xf32>
    %12 = vector.shape_cast %11 : vector<8xf32> to vector<8x1xf32>
    %13 = tpu.reciprocal %12 {approx = true} : vector<8x1xf32> -> vector<8x1xf32>
    %14 = arith.mulf %12, %13 : vector<8x1xf32>
    %cst_7 = arith.constant 2.000000e+00 : f32
    %15 = vector.broadcast %cst_7 : f32 to vector<8x1xf32>
    %16 = arith.subf %15, %14 : vector<8x1xf32>
    %17 = arith.mulf %13, %16 : vector<8x1xf32>
    %18 = vector.broadcast %17 : vector<8x1xf32> to vector<8x128xf32>
    %19 = arith.mulf %10, %18 : vector<8x128xf32>
    %c0_8 = arith.constant 0 : index
    %c0_9 = arith.constant 0 : index
    %20 = vector.load %arg4[%c0_8, %c0_9] : memref<8x128xf32, #tpu.memory_space<vmem>>, vector<8x128xf32>
    tpu.vector_store %arg4[%c0_8, %c0_9], %19 {strides = array<i32>} : memref<8x128xf32, #tpu.memory_space<vmem>>, vector<8x128xf32>,
    return
  }
  func.func @transform_0(%arg0: i32) -> (i32, i32) {
    %c0_i32 = arith.constant 0 : i32
    %c0_i32_0 = arith.constant 0 : i32
    return %arg0, %c0_i32 : i32, i32
  }
  func.func @transform_1(%arg0: i32) -> (i32, i32) {
    %c0_i32 = arith.constant 0 : i32
    %c0_i32_0 = arith.constant 0 : i32
    %c0_i32_1 = arith.constant 0 : i32
    return %c0_i32, %c0_i32_0 : i32, i32
  }
  func.func @transform_2(%arg0: i32) -> (i32, i32) {
    %c0_i32 = arith.constant 0 : i32
    %c0_i32_0 = arith.constant 0 : i32
    %c0_i32_1 = arith.constant 0 : i32
    return %c0_i32, %c0_i32_0 : i32, i32
  }
  func.func @transform_3(%arg0: i32) -> (i32, i32) {
    %c0_i32 = arith.constant 0 : i32
    %c0_i32_0 = arith.constant 0 : i32
    return %arg0, %c0_i32 : i32, i32
  }
}

</mosaic_0001>

<bundles_post_ra>
// kernel: inception_top_forward.1
= control target key start
LH: loop header
LB: loop body
LE: loop exit
PB: predicated region body
PF: predicated region fallthrough
CT: control target
= control target key end

     0   :  { %8 = vsyncpa [#allocation3], 0  ;;  %s1022_s12 = smov [#allocation2]   ;;  %s1075_s0 = inlined_call_operand.vmem [shape: bf16[8,1024], index: 0, kind: input, shape index: {}]   ;;  %s1076_s1 = inlined_call_operand.hbm [shape: bf16[1024,128], index: 1, kind: input, shape index: {}]   ;;  %s1077_s2 = inlined_call_operand.vmem [shape: f32[1,128], index: 2, kind: input, shape index: {}]   ;;  %s1078_s3 = inlined_call_operand.vmem [shape: f32[8,128], index: 3, kind: output, shape index: {}]  }
   0x1   :  { %s16_s13 = sshll.u32 %s1022_s12, 4  ;;  %s998_s16 = scalar_lea.hbm %s1076_s1, 8192  ;;  %s17_s13 = int_to_ptr.vmem [resolvable:$true] %s16_s13 }
   0x2   :  { %p999_p0 = scmp.ne.s32.totalorder %s1076_s1, %s998_s16  ;;  %p1002_p1 = scmp.lt.u32.totalorder %s998_s16, %s1076_s1 }
   0x4   :  { %p1004_p2 = pnand %p1002_p1, %p999_p0 }
   0x6   :  { %1007 = shalt.err (!%p1004_p2)
}
   0x7   :  { %s1008_s21 = scalar_lea.vmem %s17_s13, 8192  ;;  %p1013_p4 = scmp.lt.s32.totalorder %s17_s13, %s17_s13 }
   0x8   :  { %p1009_p3 = scmp.ne.s32.totalorder %s17_s13, %s1008_s21  ;;  %p1014_p5 = scmp.lt.s32.totalorder %s1008_s21, %s1008_s21 }
   0xa   :  { %p1015_p6 = por %p1014_p5, %p1013_p4 }
   0xc   :  { %p1016_p7 = pnand %p1015_p6, %p1009_p3 }
   0xe   :  { %1019 = shalt.err (!%p1016_p7)
}
   0xf   :  { %s1023_s22 = smov 64   ;;  %s1024_s23 = smov 4  }
  0x10   :  { %22 = dma.hbm_to_vmem [thread:$0]  %s1076_s1, 8192, %s17_s13, [#allocation3], %s1023_s22, %s1023_s22, %s1024_s23  }
  0x11   :  { %1020 = dma.done.wait [#allocation3], 8192  }
  0x12   :  { %1021 = vsyncadd [#allocation3], 4294959104  ;;  %v922_v0 = vld [vmem:[#allocation2 + $0x40] sm:$0xff]   ;;  %v926_v4 = vld [vmem:[#allocation2 + $0x48] sm:$0xff]  }
  0x13   :  { %v923_v1 = vld [vmem:[#allocation2 + $0xc0] sm:$0xff]   ;;  %831 = vmatprep.subr.bf16.mxu0 %v922_v0  ;;  %v927_v5 = vld [vmem:[#allocation2 + $0xc8] sm:$0xff]   ;;  %v930_v8 = vld [vmem:[#allocation2 + $0x50] sm:$0xff]  }
  0x14   :  { %v924_v2 = vld [vmem:[#allocation2] sm:$0xff]   ;;  %853 = vmatprep.subr.bf16.mxu1 %v923_v1  ;;  %v928_v6 = vld [vmem:[#allocation2 + $0x8] sm:$0xff]   ;;  %v931_v9 = vld [vmem:[#allocation2 + $0xd0] sm:$0xff]  }
  0x15   :  { %v925_v3 = vld [vmem:[#allocation2 + $0x80] sm:$0xff]   ;;  %832 = vmatpush3.bf16.msra.mxu0 %v924_v2  ;;  %v929_v7 = vld [vmem:[#allocation2 + $0x88] sm:$0xff]   ;;  %v932_v10 = vld [vmem:[#allocation2 + $0x10] sm:$0xff]  }
  0x16   :  { %854 = vmatpush3.bf16.msra.mxu1 %v925_v3  ;;  %833 = vmatprep.subr.bf16.mxu0 %v926_v4  ;;  %v933_v11 = vld [vmem:[#allocation2 + $0x90] sm:$0xff]   ;;  %v934_v12 = vld [vmem:[#allocation2 + $0x58] sm:$0xff]   ;;  %v938_v16 = vld [vmem:[#allocation2 + $0x60] sm:$0xff]  }
  0x17   :  { %855 = vmatprep.subr.bf16.mxu1 %v927_v5  ;;  %v935_v13 = vld [vmem:[#allocation2 + $0xd8] sm:$0xff]   ;;  %v939_v17 = vld [vmem:[#allocation2 + $0xe0] sm:$0xff]   ;;  %v942_v20 = vld [vmem:[#allocation2 + $0x68] sm:$0xff]  }
  0x18   :  { %v936_v14 = vld [vmem:[#allocation2 + $0x18] sm:$0xff]   ;;  %v940_v18 = vld [vmem:[#allocation2 + $0x20] sm:$0xff]   ;;  %v943_v21 = vld [vmem:[#allocation2 + $0xe8] sm:$0xff]  }
  0x19   :  { %834 = vmatpush3.bf16.msra.mxu0 %v928_v6  ;;  %v937_v15 = vld [vmem:[#allocation2 + $0x98] sm:$0xff]   ;;  %v941_v19 = vld [vmem:[#allocation2 + $0xa0] sm:$0xff]   ;;  %v944_v22 = vld [vmem:[#allocation2 + $0x28] sm:$0xff]  }
  0x1a   :  { %856 = vmatpush3.bf16.msra.mxu1 %v929_v7  ;;  %835 = vmatprep.subr.bf16.mxu0 %v930_v8  ;;  %v945_v23 = vld [vmem:[#allocation2 + $0xa8] sm:$0xff]   ;;  %v946_v24 = vld [vmem:[#allocation2 + $0x70] sm:$0xff]   ;;  %v950_v28 = vld [vmem:[#allocation2 + $0x78] sm:$0xff]  }
  0x1b   :  { %857 = vmatprep.subr.bf16.mxu1 %v931_v9  ;;  %v947_v25 = vld [vmem:[#allocation2 + $0xf0] sm:$0xff]   ;;  %v951_v29 = vld [vmem:[#allocation2 + $0xf8] sm:$0xff]   ;;  %v29_v32 = vld [vmem:[%s1075_s0] sm:$0xff] }
  0x1c   :  { %v948_v26 = vld [vmem:[#allocation2 + $0x30] sm:$0xff]   ;;  %v952_v30 = vld [vmem:[#allocation2 + $0x38] sm:$0xff]   ;;  %v30_v33 = vld [vmem:[%s1075_s0 + $0x8] sm:$0xff]  ;;  %v759_v34 = vcombine.low %v29_v32, %v29_v32  ;;  %v760_v35 = vcombine.high %v29_v32, %v29_v32 }
  0x1d   :  { %836 = vmatpush3.bf16.msra.mxu0 %v932_v10  ;;  %v949_v27 = vld [vmem:[#allocation2 + $0xb0] sm:$0xff]   ;;  %v953_v31 = vld [vmem:[#allocation2 + $0xb8] sm:$0xff]   ;;  %v761_v36 = vcombine.low %v30_v33, %v30_v33  ;;  %v762_v37 = vcombine.high %v30_v33, %v30_v33  ;;  %v958_v38 = vld [vmem:[#allocation2 + $0x140] sm:$0xff]  }
  0x1e   :  { %858 = vmatpush3.bf16.msra.mxu1 %v933_v11  ;;  %837 = vmatprep.subr.bf16.mxu0 %v934_v12  ;;  %v959_v39 = vld [vmem:[#allocation2 + $0x1c0] sm:$0xff]   ;;  %v962_v42 = vld [vmem:[#allocation2 + $0x148] sm:$0xff]   ;;  %v966_v46 = vld [vmem:[#allocation2 + $0x150] sm:$0xff]  }
  0x1f   :  { %859 = vmatprep.subr.bf16.mxu1 %v935_v13  ;;  %612 = vmatprep.mubr.bf16.mxu0 %v760_v35  ;;  %v960_v40 = vld [vmem:[#allocation2 + $0x100] sm:$0xff]   ;;  %v963_v43 = vld [vmem:[#allocation2 + $0x1c8] sm:$0xff]   ;;  %v967_v47 = vld [vmem:[#allocation2 + $0x1d0] sm:$0xff]  }
  0x20   :  { %652 = vmatprep.mubr.bf16.mxu1 %v762_v37  ;;  %v961_v41 = vld [vmem:[#allocation2 + $0x180] sm:$0xff]   ;;  %v964_v44 = vld [vmem:[#allocation2 + $0x108] sm:$0xff]   ;;  %v968_v48 = vld [vmem:[#allocation2 + $0x110] sm:$0xff]  }
  0x21   :  { %838 = vmatpush3.bf16.msra.mxu0 %v936_v14  ;;  %v965_v45 = vld [vmem:[#allocation2 + $0x188] sm:$0xff]   ;;  %v969_v49 = vld [vmem:[#allocation2 + $0x190] sm:$0xff]   ;;  %v970_v50 = vld [vmem:[#allocation2 + $0x158] sm:$0xff]  }
  0x22   :  { %860 = vmatpush3.bf16.msra.mxu1 %v937_v15  ;;  %839 = vmatprep.subr.bf16.mxu0 %v938_v16  ;;  %v971_v51 = vld [vmem:[#allocation2 + $0x1d8] sm:$0xff]   ;;  %v974_v54 = vld [vmem:[#allocation2 + $0x160] sm:$0xff]   ;;  %v978_v58 = vld [vmem:[#allocation2 + $0x168] sm:$0xff]  }
  0x23   :  { %861 = vmatprep.subr.bf16.mxu1 %v939_v17  ;;  %v972_v52 = vld [vmem:[#allocation2 + $0x118] sm:$0xff]   ;;  %v975_v55 = vld [vmem:[#allocation2 + $0x1e0] sm:$0xff]   ;;  %v979_v59 = vld [vmem:[#allocation2 + $0x1e8] sm:$0xff]  }
  0x24   :  { %v973_v53 = vld [vmem:[#allocation2 + $0x198] sm:$0xff]   ;;  %v976_v56 = vld [vmem:[#allocation2 + $0x120] sm:$0xff]   ;;  %v980_v60 = vld [vmem:[#allocation2 + $0x128] sm:$0xff]  }
  0x25   :  { %840 = vmatpush3.bf16.msra.mxu0 %v940_v18  ;;  %v977_v57 = vld [vmem:[#allocation2 + $0x1a0] sm:$0xff]   ;;  %v981_v61 = vld [vmem:[#allocation2 + $0x1a8] sm:$0xff]   ;;  %v982_v62 = vld [vmem:[#allocation2 + $0x170] sm:$0xff]  }
  0x26   :  { %862 = vmatpush3.bf16.msra.mxu1 %v941_v19  ;;  %841 = vmatprep.subr.bf16.mxu0 %v942_v20  ;;  %v983_v63 = vld [vmem:[#allocation2 + $0x1f0] sm:$0xff]   ;;  %v986_v2 = vld [vmem:[#allocation2 + $0x178] sm:$0xff]   ;;  %v758_v14 = vld [vmem:[%s1077_s2] ss:$0 sm:$0xff] }
  0x27   :  { %863 = vmatprep.subr.bf16.mxu1 %v943_v21  ;;  %v984_v0 = vld [vmem:[#allocation2 + $0x130] sm:$0xff]   ;;  %v987_v3 = vld [vmem:[#allocation2 + $0x1f8] sm:$0xff]  }
  0x28   :  { %v985_v1 = vld [vmem:[#allocation2 + $0x1b0] sm:$0xff]   ;;  %v988_v4 = vld [vmem:[#allocation2 + $0x138] sm:$0xff]  }
  0x29   :  { %842 = vmatpush3.bf16.msra.mxu0 %v944_v22  ;;  %v989_v5 = vld [vmem:[#allocation2 + $0x1b8] sm:$0xff]   ;;  %v31_v6 = vld [vmem:[%s1075_s0 + $0x10] sm:$0xff] }
  0x2a   :  { %864 = vmatpush3.bf16.msra.mxu1 %v945_v23  ;;  %843 = vmatprep.subr.bf16.mxu0 %v946_v24  ;;  %v763_v7 = vcombine.low %v31_v6, %v31_v6  ;;  %v764_v8 = vcombine.high %v31_v6, %v31_v6  ;;  %v32_v9 = vld [vmem:[%s1075_s0 + $0x18] sm:$0xff] }
  0x2b   :  { %865 = vmatprep.subr.bf16.mxu1 %v947_v25  ;;  %v765_v10 = vcombine.low %v32_v9, %v32_v9  ;;  %v766_v11 = vcombine.high %v32_v9, %v32_v9 }
  0x2d   :  { %844 = vmatpush3.bf16.msra.mxu0 %v948_v26 }
  0x2e   :  { %866 = vmatpush3.bf16.msra.mxu1 %v949_v27  ;;  %845 = vmatprep.subr.bf16.mxu0 %v950_v28 }
  0x2f   :  { %867 = vmatprep.subr.bf16.mxu1 %v951_v29 }
  0x31   :  { %846 = vmatpush3.bf16.msra.mxu0 %v952_v30 }
  0x32   :  { %868 = vmatpush3.bf16.msra.mxu1 %v953_v31  ;;  %875 = vmatprep.subr.bf16.mxu0 %v958_v38 }
  0x33   :  { %897 = vmatprep.subr.bf16.mxu1 %v959_v39 }
  0x34   :  { %613 = vmatmul.mubr.bf16.vlgmr.msra.gmra.mrb[0].mxu0 %v759_v34 }
  0x35   :  { %653 = vmatmul.mubr.bf16.vlgmr.msra.gmra.mrb[0].mxu1 %v761_v36  ;;  %876 = vmatpush3.bf16.msra.mxu0 %v960_v40 }
  0x36   :  { %898 = vmatpush3.bf16.msra.mxu1 %v961_v41  ;;  %877 = vmatprep.subr.bf16.mxu0 %v962_v42 }
  0x37   :  { %899 = vmatprep.subr.bf16.mxu1 %v963_v43  ;;  %692 = vmatprep.mubr.bf16.mxu0 %v764_v8 }
  0x38   :  { %732 = vmatprep.mubr.bf16.mxu1 %v766_v11 }
  0x39   :  { %878 = vmatpush3.bf16.msra.mxu0 %v964_v44 }
  0x3a   :  { %900 = vmatpush3.bf16.msra.mxu1 %v965_v45  ;;  %879 = vmatprep.subr.bf16.mxu0 %v966_v46 }
  0x3b   :  { %901 = vmatprep.subr.bf16.mxu1 %v967_v47 }
  0x3d   :  { %880 = vmatpush3.bf16.msra.mxu0 %v968_v48 }
  0x3e   :  { %902 = vmatpush3.bf16.msra.mxu1 %v969_v49  ;;  %881 = vmatprep.subr.bf16.mxu0 %v970_v50 }
  0x3f   :  { %903 = vmatprep.subr.bf16.mxu1 %v971_v51 }
  0x41   :  { %882 = vmatpush3.bf16.msra.mxu0 %v972_v52 }
  0x42   :  { %904 = vmatpush3.bf16.msra.mxu1 %v973_v53  ;;  %883 = vmatprep.subr.bf16.mxu0 %v974_v54 }
  0x43   :  { %905 = vmatprep.subr.bf16.mxu1 %v975_v55 }
  0x45   :  { %884 = vmatpush3.bf16.msra.mxu0 %v976_v56 }
  0x46   :  { %906 = vmatpush3.bf16.msra.mxu1 %v977_v57  ;;  %885 = vmatprep.subr.bf16.mxu0 %v978_v58 }
  0x47   :  { %907 = vmatprep.subr.bf16.mxu1 %v979_v59 }
  0x49   :  { %886 = vmatpush3.bf16.msra.mxu0 %v980_v60 }
  0x4a   :  { %908 = vmatpush3.bf16.msra.mxu1 %v981_v61  ;;  %887 = vmatprep.subr.bf16.mxu0 %v982_v62 }
  0x4b   :  { %909 = vmatprep.subr.bf16.mxu1 %v983_v63 }
  0x4d   :  { %888 = vmatpush3.bf16.msra.mxu0 %v984_v0 }
  0x4e   :  { %910 = vmatpush3.bf16.msra.mxu1 %v985_v1  ;;  %889 = vmatprep.subr.bf16.mxu0 %v986_v2 }
  0x4f   :  { %911 = vmatprep.subr.bf16.mxu1 %v987_v3 }
  0x51   :  { %890 = vmatpush3.bf16.msra.mxu0 %v988_v4 }
  0x52   :  { %912 = vmatpush3.bf16.msra.mxu1 %v989_v5 }
  0x54   :  { %693 = vmatmul.mubr.bf16.vlgmr.msra.gmra.mrb[4].mxu0 %v763_v7 }
  0x55   :  { %733 = vmatmul.mubr.bf16.vlgmr.msra.gmra.mrb[4].mxu1 %v765_v10 }
 0x107   :  { %v847_v12 = vpop.f32.mrb[0].mxu0 }
 0x108   :  { %v869_v13 = vpop.f32.mrb[0].mxu1  ;;  %v848_v15 = vpop.f32.mrb[1].mxu0 }
 0x109   :  { %v870_v16 = vpop.f32.mrb[1].mxu1  ;;  %v849_v17 = vadd.f32 %v848_v15, %v847_v12  ;;  %v850_v19 = vpop.f32.mrb[2].mxu0 }
 0x10a   :  { %v871_v18 = vadd.f32 %v870_v16, %v869_v13  ;;  %v872_v20 = vpop.f32.mrb[2].mxu1  ;;  %v851_v21 = vpop.f32.mrb[3].mxu0 }
 0x10b   :  { %v873_v22 = vpop.f32.mrb[3].mxu1  ;;  %v615_v23 = vadd.f32 %v849_v17, %v758_v14 }
 0x10d   :  { %v655_v24 = vadd.f32 %v871_v18, %v615_v23 }
 0x127   :  { %v891_v25 = vpop.f32.mrb[4].mxu0 }
 0x128   :  { %v913_v26 = vpop.f32.mrb[4].mxu1  ;;  %v892_v27 = vpop.f32.mrb[5].mxu0 }
 0x129   :  { %v914_v28 = vpop.f32.mrb[5].mxu1  ;;  %v893_v29 = vadd.f32 %v892_v27, %v891_v25  ;;  %v894_v31 = vpop.f32.mrb[6].mxu0 }
 0x12a   :  { %v915_v30 = vadd.f32 %v914_v28, %v913_v26  ;;  %v916_v32 = vpop.f32.mrb[6].mxu1  ;;  %v895_v33 = vpop.f32.mrb[7].mxu0 }
 0x12b   :  { %v917_v34 = vpop.f32.mrb[7].mxu1  ;;  %v695_v35 = vadd.f32 %v893_v29, %v655_v24 }
 0x12d   :  { %v735_v36 = vadd.f32 %v915_v30, %v695_v35 }
 0x12f   :  { %740 = vmax.xlane.f32.xlu0 %v735_v36 }
 0x1bc   :  { %v741_v37 = vpop.xlane.xlu0 %740 }
 0x1bd   :  { %v742_v38 = vsub.f32 %v735_v36, %v741_v37 }
 0x1bf   :  { %v743_v39 = vmul.f32 1.442695, %v742_v38 }
 0x1c1   :  { %994 = vpow2.f32 %v743_v39 }
 0x1cb   :  { %v995_v40 = vpop.eup %994 }
 0x1cc   :  { %745 = vadd.xlane.f32.xlu0 %v995_v40 }
 0x259   :  { %v746_v41 = vpop.xlane.xlu0 %745 }
 0x25a   :  { %996 = vrcp.f32 %v746_v41 }
 0x264   :  { %v997_v42 = vpop.eup %996 }
 0x265   :  { %v748_v43 = vmul.f32 %v997_v42, %v746_v41 }
 0x267   :  { %v749_v44 = vsub.f32 2.0, %v748_v43 }
 0x269   :  { %v750_v45 = vmul.f32 %v997_v42, %v749_v44 }
 0x26b   :  { %v751_v46 = vmul.f32 %v995_v40, %v750_v45 }
 0x26d   :  { %752 = vst [vmem:[%s1078_s3] sm:$0xff] %v751_v46 }
 0x26e   :  { %757 = vsyncpa [#allocation3], 1 }

</bundles_post_ra>
